<compile_context>
chip_gen: v7x
topology: tpu7x:2x2x1
jax: 0.10.0
libtpu: 0.0.40
codegen_flags: <defaults>
</compile_context>

<pallas_src>
import math

import jax
import jax.numpy as jnp
from jax import lax
from jax.experimental import pallas as pl
from jax.experimental.pallas import tpu as pltpu


def _cdiv(a, b):
    return -(-a // b)


def _round_up(a, b):
    return _cdiv(a, b) * b


def _make_gateconv_kernel(*, k_t, s_t, d_t, F_out, M, has_halo, gate):
    """Build the fused conv + bias + gate kernel for one (batch, time-tile) step.

    Refs (in order):
      x_ref  : (s_t, Kf, M)        bf16  main frequency-unfolded slab (lane = t*F_out+f)
      h_ref  : (s_t, Kf, H128)     bf16  halo slab (next 128+ lanes)      [if has_halo]
      w_ref  : (k_t, C_out, Kf)    bf16  per-time-tap weights, "out" half
      wg_ref : (k_t, C_out, Kf)    bf16  per-time-tap weights, "gate" half [if gate]
      b_ref  : (C_out, 1)          f32
      bg_ref : (C_out, 1)          f32                                      [if gate]
      o_ref  : (C_out, M)          out dtype  (NCHW-layout output block)
      acc_o  : (C_out, M)          f32 VMEM scratch
      acc_g  : (C_out, M)          f32 VMEM scratch                         [if gate]
    """
    # Static per-tap (time) phase / lane-offset table (polyphase on s_t).
    taps = []
    for kt in range(k_t):
        off = kt * d_t
        taps.append((off % s_t, (off // s_t) * F_out))

    def kernel(*refs):
        i = 0
        x_ref = refs[i]; i += 1
        h_ref = None
        if has_halo:
            h_ref = refs[i]; i += 1
        w_ref = refs[i]; i += 1
        wg_ref = None
        if gate:
            wg_ref = refs[i]; i += 1
        b_ref = refs[i]; i += 1
        bg_ref = None
        if gate:
            bg_ref = refs[i]; i += 1
        o_ref = refs[i]; i += 1
        acc_o = refs[i]; i += 1
        acc_g = refs[i] if gate else None

        def tap_accumulate(acc, w3, kt, init):
            pt, lane_off = taps[kt]
            w = w3[kt]                                            # (C_out, Kf) bf16
            if lane_off == 0:
                contrib = jnp.dot(w, x_ref[pt],
                                  preferred_element_type=jnp.float32)
                if init:
                    acc[...] = contrib
                else:
                    acc[...] += contrib
            else:
                # Tap window spills past the main block by `lane_off` lanes; the
                # tail comes from the halo view of the same HBM array.
                w_main = M - lane_off
                if w_main > 0:
                    acc[:, pl.ds(0, w_main)] += jnp.dot(
                        w, x_ref[pt, :, pl.ds(lane_off, w_main)],
                        preferred_element_type=jnp.float32)
                acc[:, pl.ds(w_main, lane_off)] += jnp.dot(
                    w, h_ref[pt, :, pl.ds(0, lane_off)],
                    preferred_element_type=jnp.float32)

        for kt in range(k_t):
            tap_accumulate(acc_o, w_ref, kt, init=(kt == 0))
            if gate:
                tap_accumulate(acc_g, wg_ref, kt, init=(kt == 0))

        y = acc_o[...] + b_ref[...]                               # (C_out, M) f32
        if gate:
            y = y * jax.nn.sigmoid(acc_g[...] + bg_ref[...])
        o_ref[...] = y.astype(o_ref.dtype)

    return kernel


class GateConv2dPallas:
    """Pallas implementation of DPCRN GateConv2d (depth_sep=False branch)."""

    def __init__(self, in_channels, out_channels, kernel_size, stride, padding,
                 dilation=(1, 1), gate=True, time_tile=None,
                 out_dtype=jnp.float32, key=None):
        self.in_channels = in_channels
        self.out_channels = out_channels
        self.kernel_size = tuple(kernel_size)
        self.stride = tuple(stride)
        self.padding = tuple(padding)
        self.dilation = tuple(dilation)
        self.gate = gate
        self.time_tile = time_tile          # None -> auto from VMEM budget
        self.out_dtype = out_dtype          # use bf16 on v6e/v7x to halve writeback

        k_t, k_f = self.kernel_size
        c2 = out_channels * (2 if gate else 1)
        fan_in = in_channels * k_t * k_f
        bound = fan_in ** -0.5
        if key is None:
            key = jax.random.PRNGKey(0)
        kw, kb = jax.random.split(key)
        # PyTorch Conv2d-style uniform init (deterministic synthetic parameters).
        self.w = jax.random.uniform(kw, (c2, in_channels, k_t, k_f), jnp.float32,
                                    -bound, bound)
        self.b = jax.random.uniform(kb, (c2,), jnp.float32, -bound, bound)

        # Hoisted parameter rearrangement: per-time-tap (C2, k_f*C_in) matrices
        # with K ordered (kf, c_in) to match the frequency unfold; split into the
        # "out" / "gate" halves so the kernel never lane-slices the result.
        w_lhs = jnp.transpose(self.w, (2, 0, 3, 1))        # (k_t, C2, k_f, C_in)
        w_lhs = w_lhs.reshape(k_t, c2, k_f * in_channels).astype(jnp.bfloat16)
        if gate:
            self.w_out = w_lhs[:, :out_channels]
            self.w_gate = w_lhs[:, out_channels:]
            self.b_out = self.b[:out_channels].reshape(out_channels, 1)
            self.b_gate = self.b[out_channels:].reshape(out_channels, 1)
        else:
            self.w_out = w_lhs
            self.w_gate = None
            self.b_out = self.b.reshape(out_channels, 1)
            self.b_gate = None

        self._fwd = jax.jit(self._forward)

    def _forward(self, x):
        B, C, T, F = x.shape
        k_t, k_f = self.kernel_size
        s_t, s_f = self.stride
        d_t, d_f = self.dilation
        p0, p1 = self.padding
        C_out = self.out_channels
        gate = self.gate
        Kf = k_f * C

        # --- early bf16 cast, causal time pad, user frequency pad -------------
        xb = x.astype(jnp.bfloat16)
        xp = jnp.pad(xb, ((0, 0), (0, 0), (k_t - 1, 0), (p0, p1)))
        Tp = T + k_t - 1
        Fp = F + p0 + p1
        T_out = (Tp - d_t * (k_t - 1) - 1) // s_t + 1
        F_out = (Fp - d_f * (k_f - 1) - 1) // s_f + 1

        # --- frequency unfold, channel-major K=(kf, c_in): (B, Kf, Tp, F_out) --
        ftaps = [lax.slice_in_dim(xp, kf * d_f,
                                  kf * d_f + (F_out - 1) * s_f + 1, s_f, axis=3)
                 for kf in range(k_f)]
        xu = jnp.stack(ftaps, axis=1).reshape(B, Kf, Tp, F_out)

        # --- tile / halo geometry ----------------------------------------------
        qt_max = ((k_t - 1) * d_t) // s_t              # time halo in output rows
        has_halo = qt_max > 0
        H128 = _round_up(qt_max * F_out, 128) if has_halo else 0
        granule = (H128 if has_halo else 128)
        granule = granule // math.gcd(granule, F_out)  # TT granule: TT*F_out % 128 (and % H128)

        out_itemsize = jnp.dtype(self.out_dtype).itemsize
        if self.time_tile is None:
            # Size TT from a VMEM budget (~8 MiB per in+out block before double buffering).
            row_bytes = s_t * Kf * F_out * 2 + C_out * F_out * out_itemsize * 2
            rows = max(1, (8 * 1024 * 1024) // max(1, row_bytes))
        else:
            rows = int(self.time_tile)
        TT = _round_up(min(max(rows, 1), max(T_out, 1)), granule)
        n_t = _cdiv(T_out, TT)
        T_out_p = n_t * TT
        M = TT * F_out

        halo_q = _cdiv(H128, F_out) if has_halo else 0
        Tq_total = T_out_p + halo_q
        Tp_need = Tq_total * s_t
        if Tp_need > Tp:
            xu = jnp.pad(xu, ((0, 0), (0, 0), (0, Tp_need - Tp), (0, 0)))
        elif Tp_need < Tp:
            xu = xu[:, :, :Tp_need, :]

        # Time polyphase + lane flatten: (B, s_t, Kf, Tq_total*F_out).
        xu = xu.reshape(B, Kf, Tq_total, s_t, F_out)
        xu = jnp.transpose(xu, (0, 3, 1, 2, 4)).reshape(B, s_t, Kf, Tq_total * F_out)

        # --- fused conv + bias + gate kernel -----------------------------------
        kernel = _make_gateconv_kernel(k_t=k_t, s_t=s_t, d_t=d_t, F_out=F_out,
                                       M=M, has_halo=has_halo, gate=gate)

        in_specs = [pl.BlockSpec((None, s_t, Kf, M), lambda b, t: (b, 0, 0, t))]
        operands = [xu]
        if has_halo:
            halo_step = M // H128
            in_specs.append(pl.BlockSpec((None, s_t, Kf, H128),
                                         lambda b, t: (b, 0, 0, (t + 1) * halo_step)))
            operands.append(xu)                         # second view of the same array
        in_specs.append(pl.BlockSpec((k_t, C_out, Kf), lambda b, t: (0, 0, 0)))
        operands.append(self.w_out)
        if gate:
            in_specs.append(pl.BlockSpec((k_t, C_out, Kf), lambda b, t: (0, 0, 0)))
            operands.append(self.w_gate)
        in_specs.append(pl.BlockSpec((C_out, 1), lambda b, t: (0, 0)))
        operands.append(self.b_out)
        if gate:
            in_specs.append(pl.BlockSpec((C_out, 1), lambda b, t: (0, 0)))
            operands.append(self.b_gate)

        scratch = [pltpu.VMEM((C_out, M), jnp.float32)]
        if gate:
            scratch.append(pltpu.VMEM((C_out, M), jnp.float32))

        # VMEM budgeting (double-buffered blocks + resident scratch), capped for v7x.
        in_blk = s_t * Kf * M * 2
        halo_blk = s_t * Kf * H128 * 2 if has_halo else 0
        out_blk = C_out * M * out_itemsize
        wgt = (2 if gate else 1) * (k_t * C_out * Kf * 2 + C_out * 4)
        acc_blk = (2 if gate else 1) * C_out * M * 4
        est = 2 * (in_blk + halo_blk + out_blk + wgt) + acc_blk
        vmem_limit = int(min(max(2 * est, 32 * 1024 * 1024), 48 * 1024 * 1024))

        out = pl.pallas_call(
            kernel,
            out_shape=jax.ShapeDtypeStruct((B, C_out, T_out_p * F_out),
                                           self.out_dtype),
            grid=(B, n_t),
            in_specs=in_specs,
            out_specs=pl.BlockSpec((None, C_out, M), lambda b, t: (b, 0, t)),
            scratch_shapes=scratch,
            compiler_params=pltpu.CompilerParams(
                dimension_semantics=("parallel", "parallel"),
                vmem_limit_bytes=vmem_limit),
        )(*operands)

        # Output is already channel-major (NCHW): reshape is free, slice off the
        # padded tail time rows only if there is one.
        out = out.reshape(B, C_out, T_out_p, F_out)
        if T_out_p != T_out:
            out = out[:, :, :T_out]
        return out

    def __call__(self, x):
        if x.ndim == 3:                          # matches inputs.unsqueeze(dim=1)
            x = x[:, None]
        return self._fwd(x)


def _reference(x, w, b, kernel_size, stride, padding, dilation, gate):
    """Pure-JAX f32 reference of the PyTorch GateConv2d forward."""
    k_t, _ = kernel_size
    p0, p1 = padding
    xp = jnp.pad(x, ((0, 0), (0, 0), (k_t - 1, 0), (p0, p1)))
    y = lax.conv_general_dilated(
        xp, w, window_strides=stride, padding="VALID",
        rhs_dilation=dilation, dimension_numbers=("NCHW", "OIHW", "NCHW"))
    y = y + b.reshape(1, -1, 1, 1)
    if gate:
        c = y.shape[1] // 2
        return y[:, :c] * jax.nn.sigmoid(y[:, c:])
    return y


if __name__ == "__main__":
    key = jax.random.PRNGKey(0)
    key, xk, mk1, mk2 = jax.random.split(key, 4)

    # Input: (B, C, T, F) NCHW, small synthetic spectrogram-like tensor.
    B, C_in, T, F = 2, 4, 16, 16
    x = jax.random.normal(xk, (B, C_in, T, F), dtype=jnp.float32)

    # --- config 1: module defaults (gate=True), strided frequency conv -------
    mod = GateConv2dPallas(in_channels=C_in, out_channels=16,
                           kernel_size=(2, 5), stride=(1, 2), padding=[2, 2],
                           dilation=(1, 1), gate=True, key=mk1)
    out = mod(x)
    jax.block_until_ready(out)
    assert out.shape == (B, 16, 16, 8), out.shape
    ref = _reference(x, mod.w, mod.b, (2, 5), (1, 2), (2, 2), (1, 1), True)
    err = float(jnp.max(jnp.abs(out - ref)))
    assert err < 5e-2, f"gate=True max abs err {err}"

    # --- config 2: gate=False, unit stride, multiple time tiles + halo path ---
    mod2 = GateConv2dPallas(in_channels=C_in, out_channels=8,
                            kernel_size=(2, 3), stride=(1, 1), padding=[1, 1],
                            dilation=(1, 1), gate=False, time_tile=8, key=mk2)
    out2 = mod2(x)
    jax.block_until_ready(out2)
    assert out2.shape == (B, 8, 16, 16), out2.shape
    ref2 = _reference(x, mod2.w, mod2.b, (2, 3), (1, 1), (1, 1), (1, 1), False)
    err2 = float(jnp.max(jnp.abs(out2 - ref2)))
    assert err2 < 5e-2, f"gate=False max abs err {err2}"

    print("KERNEL_OK")
</pallas_src>

<mosaic_0001>
module attributes {stable_mosaic.version = 11 : i64} {
  func.func @kernel(%arg0: i32, %arg1: i32, %arg2: memref<1x1x20x128xbf16, #tpu.memory_space<vmem>>, %arg3: memref<1x1x20x128xbf16, #tpu.memory_space<vmem>>, %arg4: memref<2x16x20xbf16, #tpu.memory_space<vmem>>, %arg5: memref<2x16x20xbf16, #tpu.memory_space<vmem>>, %arg6: memref<16x1xf32, #tpu.memory_space<vmem>>, %arg7: memref<16x1xf32, #tpu.memory_space<vmem>>, %arg8: memref<1x16x128xf32, #tpu.memory_space<vmem>>, %arg9: memref<16x128xf32, #tpu.memory_space<vmem>>, %arg10: memref<16x128xf32, #tpu.memory_space<vmem>>) attributes {dimension_semantics = [#tpu.dimension_semantics<parallel>, #tpu.dimension_semantics<parallel>], iteration_bounds = array<i64: 2, 1>, scalar_prefetch = 0 : i64, scratch_operands = 2 : i64, tpu.core_type = #tpu.core_type<tc>, window_params = [{transform_indices = @transform_0, window_bounds = array<i64: 1, 1, 20, 128>}, {transform_indices = @transform_1, window_bounds = array<i64: 1, 1, 20, 128>}, {pipeline_mode = #tpu.pipeline_mode<synchronous>, transform_indices = @transform_2, window_bounds = array<i64: 2, 16, 20>}, {pipeline_mode = #tpu.pipeline_mode<synchronous>, transform_indices = @transform_3, window_bounds = array<i64: 2, 16, 20>}, {pipeline_mode = #tpu.pipeline_mode<synchronous>, transform_indices = @transform_4, window_bounds = array<i64: 16, 1>}, {pipeline_mode = #tpu.pipeline_mode<synchronous>, transform_indices = @transform_5, window_bounds = array<i64: 16, 1>}, {transform_indices = @transform_6, window_bounds = array<i64: 1, 16, 128>}]} {
    %c0 = arith.constant 0 : index
    %c0_0 = arith.constant 0 : index
    %c0_1 = arith.constant 0 : index
    %0 = vector.load %arg4[%c0, %c0_0, %c0_1] : memref<2x16x20xbf16, #tpu.memory_space<vmem>>, vector<1x16x20xbf16>
    %1 = vector.shape_cast %0 : vector<1x16x20xbf16> to vector<16x20xbf16>
    %c0_2 = arith.constant 0 : index
    %c0_3 = arith.constant 0 : index
    %c0_4 = arith.constant 0 : index
    %c0_5 = arith.constant 0 : index
    %2 = vector.load %arg2[%c0_2, %c0_3, %c0_4, %c0_5] : memref<1x1x20x128xbf16, #tpu.memory_space<vmem>>, vector<1x1x20x128xbf16>
    %3 = vector.shape_cast %2 : vector<1x1x20x128xbf16> to vector<20x128xbf16>
    %cst = arith.constant dense<0.000000e+00> : vector<16x128xf32>
    %4 = tpu.matmul %1, %3, %cst {dimension_numbers = #tpu.dot_dimension_numbers<[1], [0], [0], [1], [0, 0, 1, 1], [], []>} : vector<16x20xbf16>, vector<20x128xbf16>, vector<16x128xf32> -> vector<16x128xf32>
    %c0_6 = arith.constant 0 : index
    %c0_7 = arith.constant 0 : index
    %5 = vector.load %arg9[%c0_6, %c0_7] : memref<16x128xf32, #tpu.memory_space<vmem>>, vector<16x128xf32>
    tpu.vector_store %arg9[%c0_6, %c0_7], %4 {strides = array<i32>} : memref<16x128xf32, #tpu.memory_space<vmem>>, vector<16x128xf32>,
    %c0_8 = arith.constant 0 : index
    %c0_9 = arith.constant 0 : index
    %c0_10 = arith.constant 0 : index
    %6 = vector.load %arg5[%c0_8, %c0_9, %c0_10] : memref<2x16x20xbf16, #tpu.memory_space<vmem>>, vector<1x16x20xbf16>
    %7 = vector.shape_cast %6 : vector<1x16x20xbf16> to vector<16x20xbf16>
    %c0_11 = arith.constant 0 : index
    %c0_12 = arith.constant 0 : index
    %c0_13 = arith.constant 0 : index
    %c0_14 = arith.constant 0 : index
    %8 = vector.load %arg2[%c0_11, %c0_12, %c0_13, %c0_14] : memref<1x1x20x128xbf16, #tpu.memory_space<vmem>>, vector<1x1x20x128xbf16>
    %9 = vector.shape_cast %8 : vector<1x1x20x128xbf16> to vector<20x128xbf16>
    %cst_15 = arith.constant dense<0.000000e+00> : vector<16x128xf32>
    %10 = tpu.matmul %7, %9, %cst_15 {dimension_numbers = #tpu.dot_dimension_numbers<[1], [0], [0], [1], [0, 0, 1, 1], [], []>} : vector<16x20xbf16>, vector<20x128xbf16>, vector<16x128xf32> -> vector<16x128xf32>
    %c0_16 = arith.constant 0 : index
    %c0_17 = arith.constant 0 : index
    %11 = vector.load %arg10[%c0_16, %c0_17] : memref<16x128xf32, #tpu.memory_space<vmem>>, vector<16x128xf32>
    tpu.vector_store %arg10[%c0_16, %c0_17], %10 {strides = array<i32>} : memref<16x128xf32, #tpu.memory_space<vmem>>, vector<16x128xf32>,
    %c1 = arith.constant 1 : index
    %c0_18 = arith.constant 0 : index
    %c0_19 = arith.constant 0 : index
    %12 = vector.load %arg4[%c1, %c0_18, %c0_19] : memref<2x16x20xbf16, #tpu.memory_space<vmem>>, vector<1x16x20xbf16>
    %13 = vector.shape_cast %12 : vector<1x16x20xbf16> to vector<16x20xbf16>
    %c0_20 = arith.constant 0 : index
    %c0_21 = arith.constant 0 : index
    %14 = vector.load %arg9[%c0_20, %c0_21] : memref<16x128xf32, #tpu.memory_space<vmem>>, vector<16x120xf32>
    %c0_22 = arith.constant 0 : index
    %c0_23 = arith.constant 0 : index
    %c0_24 = arith.constant 0 : index
    %c8 = arith.constant 8 : index
    %15 = vector.load %arg2[%c0_22, %c0_23, %c0_24, %c8] : memref<1x1x20x128xbf16, #tpu.memory_space<vmem>>, vector<1x1x20x120xbf16>
    %16 = vector.shape_cast %15 : vector<1x1x20x120xbf16> to vector<20x120xbf16>
    %cst_25 = arith.constant dense<0.000000e+00> : vector<16x120xf32>
    %17 = tpu.matmul %13, %16, %cst_25 {dimension_numbers = #tpu.dot_dimension_numbers<[1], [0], [0], [1], [0, 0, 1, 1], [], []>} : vector<16x20xbf16>, vector<20x120xbf16>, vector<16x120xf32> -> vector<16x120xf32>
    %18 = arith.addf %14, %17 : vector<16x120xf32>
    %c0_26 = arith.constant 0 : index
    %c0_27 = arith.constant 0 : index
    %19 = vector.load %arg9[%c0_26, %c0_27] : memref<16x128xf32, #tpu.memory_space<vmem>>, vector<16x120xf32>
    tpu.vector_store %arg9[%c0_26, %c0_27], %18 {strides = array<i32>} : memref<16x128xf32, #tpu.memory_space<vmem>>, vector<16x120xf32>,
    %c0_28 = arith.constant 0 : index
    %c120 = arith.constant 120 : index
    %20 = vector.load %arg9[%c0_28, %c120] : memref<16x128xf32, #tpu.memory_space<vmem>>, vector<16x8xf32>
    %c0_29 = arith.constant 0 : index
    %c0_30 = arith.constant 0 : index
    %c0_31 = arith.constant 0 : index
    %c0_32 = arith.constant 0 : index
    %21 = vector.load %arg3[%c0_29, %c0_30, %c0_31, %c0_32] : memref<1x1x20x128xbf16, #tpu.memory_space<vmem>>, vector<1x1x20x8xbf16>
    %22 = vector.shape_cast %21 : vector<1x1x20x8xbf16> to vector<20x8xbf16>
    %cst_33 = arith.constant dense<0.000000e+00> : vector<16x8xf32>
    %23 = tpu.matmul %13, %22, %cst_33 {dimension_numbers = #tpu.dot_dimension_numbers<[1], [0], [0], [1], [0, 0, 1, 1], [], []>} : vector<16x20xbf16>, vector<20x8xbf16>, vector<16x8xf32> -> vector<16x8xf32>
    %24 = arith.addf %20, %23 : vector<16x8xf32>
    %c0_34 = arith.constant 0 : index
    %c120_35 = arith.constant 120 : index
    %25 = vector.load %arg9[%c0_34, %c120_35] : memref<16x128xf32, #tpu.memory_space<vmem>>, vector<16x8xf32>
    tpu.vector_store %arg9[%c0_34, %c120_35], %24 {strides = array<i32>} : memref<16x128xf32, #tpu.memory_space<vmem>>, vector<16x8xf32>,
    %c1_36 = arith.constant 1 : index
    %c0_37 = arith.constant 0 : index
    %c0_38 = arith.constant 0 : index
    %26 = vector.load %arg5[%c1_36, %c0_37, %c0_38] : memref<2x16x20xbf16, #tpu.memory_space<vmem>>, vector<1x16x20xbf16>
    %27 = vector.shape_cast %26 : vector<1x16x20xbf16> to vector<16x20xbf16>
    %c0_39 = arith.constant 0 : index
    %c0_40 = arith.constant 0 : index
    %28 = vector.load %arg10[%c0_39, %c0_40] : memref<16x128xf32, #tpu.memory_space<vmem>>, vector<16x120xf32>
    %c0_41 = arith.constant 0 : index
    %c0_42 = arith.constant 0 : index
    %c0_43 = arith.constant 0 : index
    %c8_44 = arith.constant 8 : index
    %29 = vector.load %arg2[%c0_41, %c0_42, %c0_43, %c8_44] : memref<1x1x20x128xbf16, #tpu.memory_space<vmem>>, vector<1x1x20x120xbf16>
    %30 = vector.shape_cast %29 : vector<1x1x20x120xbf16> to vector<20x120xbf16>
    %cst_45 = arith.constant dense<0.000000e+00> : vector<16x120xf32>
    %31 = tpu.matmul %27, %30, %cst_45 {dimension_numbers = #tpu.dot_dimension_numbers<[1], [0], [0], [1], [0, 0, 1, 1], [], []>} : vector<16x20xbf16>, vector<20x120xbf16>, vector<16x120xf32> -> vector<16x120xf32>
    %32 = arith.addf %28, %31 : vector<16x120xf32>
    %c0_46 = arith.constant 0 : index
    %c0_47 = arith.constant 0 : index
    %33 = vector.load %arg10[%c0_46, %c0_47] : memref<16x128xf32, #tpu.memory_space<vmem>>, vector<16x120xf32>
    tpu.vector_store %arg10[%c0_46, %c0_47], %32 {strides = array<i32>} : memref<16x128xf32, #tpu.memory_space<vmem>>, vector<16x120xf32>,
    %c0_48 = arith.constant 0 : index
    %c120_49 = arith.constant 120 : index
    %34 = vector.load %arg10[%c0_48, %c120_49] : memref<16x128xf32, #tpu.memory_space<vmem>>, vector<16x8xf32>
    %c0_50 = arith.constant 0 : index
    %c0_51 = arith.constant 0 : index
    %c0_52 = arith.constant 0 : index
    %c0_53 = arith.constant 0 : index
    %35 = vector.load %arg3[%c0_50, %c0_51, %c0_52, %c0_53] : memref<1x1x20x128xbf16, #tpu.memory_space<vmem>>, vector<1x1x20x8xbf16>
    %36 = vector.shape_cast %35 : vector<1x1x20x8xbf16> to vector<20x8xbf16>
    %cst_54 = arith.constant dense<0.000000e+00> : vector<16x8xf32>
    %37 = tpu.matmul %27, %36, %cst_54 {dimension_numbers = #tpu.dot_dimension_numbers<[1], [0], [0], [1], [0, 0, 1, 1], [], []>} : vector<16x20xbf16>, vector<20x8xbf16>, vector<16x8xf32> -> vector<16x8xf32>
    %38 = arith.addf %34, %37 : vector<16x8xf32>
    %c0_55 = arith.constant 0 : index
    %c120_56 = arith.constant 120 : index
    %39 = vector.load %arg10[%c0_55, %c120_56] : memref<16x128xf32, #tpu.memory_space<vmem>>, vector<16x8xf32>
    tpu.vector_store %arg10[%c0_55, %c120_56], %38 {strides = array<i32>} : memref<16x128xf32, #tpu.memory_space<vmem>>, vector<16x8xf32>,
    %c0_57 = arith.constant 0 : index
    %c0_58 = arith.constant 0 : index
    %40 = vector.load %arg9[%c0_57, %c0_58] : memref<16x128xf32, #tpu.memory_space<vmem>>, vector<16x128xf32>
    %c0_59 = arith.constant 0 : index
    %c0_60 = arith.constant 0 : index
    %41 = vector.load %arg6[%c0_59, %c0_60] : memref<16x1xf32, #tpu.memory_space<vmem>>, vector<16x1xf32>
    %42 = vector.broadcast %41 : vector<16x1xf32> to vector<16x128xf32>
    %43 = arith.addf %40, %42 : vector<16x128xf32>
    %c0_61 = arith.constant 0 : index
    %c0_62 = arith.constant 0 : index
    %44 = vector.load %arg10[%c0_61, %c0_62] : memref<16x128xf32, #tpu.memory_space<vmem>>, vector<16x128xf32>
    %c0_63 = arith.constant 0 : index
    %c0_64 = arith.constant 0 : index
    %45 = vector.load %arg7[%c0_63, %c0_64] : memref<16x1xf32, #tpu.memory_space<vmem>>, vector<16x1xf32>
    %46 = vector.broadcast %45 : vector<16x1xf32> to vector<16x128xf32>
    %47 = arith.addf %44, %46 : vector<16x128xf32>
    %48 = arith.negf %47 : vector<16x128xf32>
    %49 = math.exp %48 : vector<16x128xf32>
    %cst_65 = arith.constant 1.000000e+00 : f32
    %50 = vector.broadcast %cst_65 : f32 to vector<16x128xf32>
    %51 = arith.addf %50, %49 : vector<16x128xf32>
    %52 = arith.divf %50, %51 : vector<16x128xf32>
    %53 = arith.mulf %43, %52 : vector<16x128xf32>
    %c0_66 = arith.constant 0 : index
    %c0_67 = arith.constant 0 : index
    %c0_68 = arith.constant 0 : index
    %54 = vector.load %arg8[%c0_66, %c0_67, %c0_68] : memref<1x16x128xf32, #tpu.memory_space<vmem>>, vector<1x16x128xf32>
    %55 = vector.shape_cast %54 : vector<1x16x128xf32> to vector<16x128xf32>
    %56 = vector.shape_cast %53 : vector<16x128xf32> to vector<1x16x128xf32>
    tpu.vector_store %arg8[%c0_66, %c0_67, %c0_68], %56 {strides = array<i32>} : memref<1x16x128xf32, #tpu.memory_space<vmem>>, vector<1x16x128xf32>,
    return
  }
  func.func @transform_0(%arg0: i32, %arg1: i32) -> (i32, i32, i32, i32) {
    %c0_i32 = arith.constant 0 : i32
    %c0_i32_0 = arith.constant 0 : i32
    %c0_i32_1 = arith.constant 0 : i32
    return %arg0, %c0_i32, %c0_i32_0, %arg1 : i32, i32, i32, i32
  }
  func.func @transform_1(%arg0: i32, %arg1: i32) -> (i32, i32, i32, i32) {
    %c1_i32 = arith.constant 1 : i32
    %0 = arith.addi %arg1, %c1_i32 : i32
    %c1_i32_0 = arith.constant 1 : i32
    %1 = arith.muli %0, %c1_i32_0 : i32
    %c0_i32 = arith.constant 0 : i32
    %c0_i32_1 = arith.constant 0 : i32
    %c0_i32_2 = arith.constant 0 : i32
    return %arg0, %c0_i32, %c0_i32_1, %1 : i32, i32, i32, i32
  }
  func.func @transform_2(%arg0: i32, %arg1: i32) -> (i32, i32, i32) {
    %c0_i32 = arith.constant 0 : i32
    %c0_i32_0 = arith.constant 0 : i32
    %c0_i32_1 = arith.constant 0 : i32
    %c0_i32_2 = arith.constant 0 : i32
    return %c0_i32, %c0_i32_0, %c0_i32_1 : i32, i32, i32
  }
  func.func @transform_3(%arg0: i32, %arg1: i32) -> (i32, i32, i32) {
    %c0_i32 = arith.constant 0 : i32
    %c0_i32_0 = arith.constant 0 : i32
    %c0_i32_1 = arith.constant 0 : i32
    %c0_i32_2 = arith.constant 0 : i32
    return %c0_i32, %c0_i32_0, %c0_i32_1 : i32, i32, i32
  }
  func.func @transform_4(%arg0: i32, %arg1: i32) -> (i32, i32) {
    %c0_i32 = arith.constant 0 : i32
    %c0_i32_0 = arith.constant 0 : i32
    %c0_i32_1 = arith.constant 0 : i32
    return %c0_i32, %c0_i32_0 : i32, i32
  }
  func.func @transform_5(%arg0: i32, %arg1: i32) -> (i32, i32) {
    %c0_i32 = arith.constant 0 : i32
    %c0_i32_0 = arith.constant 0 : i32
    %c0_i32_1 = arith.constant 0 : i32
    return %c0_i32, %c0_i32_0 : i32, i32
  }
  func.func @transform_6(%arg0: i32, %arg1: i32) -> (i32, i32, i32) {
    %c0_i32 = arith.constant 0 : i32
    %c0_i32_0 = arith.constant 0 : i32
    return %arg0, %c0_i32, %arg1 : i32, i32, i32
  }
}

</mosaic_0001>

<bundles_post_ra>
// kernel: _forward.1
= control target key start
LH: loop header
LB: loop body
LE: loop exit
PB: predicated region body
PF: predicated region fallthrough
CT: control target
= control target key end

     0   :  { %s1253_s21 = smov 0   ;;  %s1255_s22 = smov 0   ;;  %s1404_s0 = inlined_call_operand.vmem [shape: bf16[2,1,20,256], index: 0, kind: input, shape index: {}, may-alias: {0,1}]   ;;  %s1405_s1 = inlined_call_operand.vmem [shape: bf16[2,1,20,256], index: 1, kind: input, shape index: {}, may-alias: {0,1}]   ;;  %s1406_s2 = inlined_call_operand.vmem [shape: bf16[2,16,20], index: 2, kind: input, shape index: {}]   ;;  %s1407_s3 = inlined_call_operand.vmem [shape: bf16[2,16,20], index: 3, kind: input, shape index: {}]   ;;  %s1408_s4 = inlined_call_operand.vmem [shape: f32[16,1], index: 4, kind: input, shape index: {}]   ;;  %s1409_s5 = inlined_call_operand.vmem [shape: f32[16,1], index: 5, kind: input, shape index: {}]   ;;  %s1410_s6 = inlined_call_operand.vmem [shape: f32[2,16,128], index: 6, kind: output, shape index: {}]  }
   0x1   :  { %s1257_s23 = smov 0   ;;  %s1259_s24 = smov 0  }
   0x2   :  { %s1261_s25 = smov 0  }
   0x3 LB: > { %s28_s26 = sadd.s32 1, %s1208_s24  ;;  %p44_p1 = scmp.ne.s32.totalorder %s1200_s22, %s1196_s21  ;;  %s1212_s25 = sphi %s1261_s25, %s16_s25   ;;  %s1208_s24 = sphi %s1259_s24, %s1415_s24   ;;  %s1204_s23 = sphi %s1257_s23, %s1414_s23   ;;  %s1200_s22 = sphi %s1255_s22, %s1413_s22   ;;  %s1196_s21 = sphi %s1253_s21, %s1412_s21  }
   0x4   : > { %p30_p0 = scmp.ge.s32.totalorder %s28_s26, 2  ;;  %p45_p2 = scmp.eq.s32.totalorder %s1212_s25, 0 }
   0x5   : > { %s37_s29 = sadd.s32 1, %s1200_s22  ;;  %p994_p5 = scmp.ge.s32.totalorder %s1212_s25, 2 }
   0x6   : > { %s1417_s26 = smov (%p30_p0, %s28_s26), 0  ;;  %p1284_p3 = por %p45_p2, %p44_p1 }
   0x7   : > { %s32_s28 = ssub.s32 %s1208_s24, %s1417_s26  ;;  %224 = sbr.rel (%p994_p5) target bundleno = 28 (0x1c), region = 32 }
   0x8   : > { %p35_p4 = scmp.eq.s32.totalorder %s32_s28, 0 }
   0xa   : > { %s1292_s30 = scalar_select %p35_p4, %s1200_s22, %s37_s29  }
   0xe   : > { %227 = sbr.rel (!%p1284_p3) target bundleno = 21 (0x15), region = 36  ;;  %s229_s7 = sand.u32 (%p1284_p3), 1, %s1200_s22  }
   0xf   : > { %s1101_s8 = smul.u32 (%p1284_p3), 24, %s1208_s24 }
  0x10   : > { %s1100_s9 = smul.u32 (%p1284_p3), 12, %s229_s7 }
  0x11   : > { %s235_s12 = scalar_lea.vmem (%p1284_p3), %s1404_s0, %s1101_s8 }
  0x12   : > { %v251_v0 = vld [vmem:[%s235_s12] sm:$0xf] (%p1284_p3)  ;;  %v253_v1 = vld [vmem:[%s235_s12 + $0x8] sm:$0xf] (%p1284_p3)  ;;  %s231_s13 = scalar_lea.vmem (%p1284_p3), [#allocation4], %s1100_s9 }
  0x13   : > { %252 = vst [vmem:[%s231_s13] sm:$0xf] (%p1284_p3), %v251_v0  ;;  %254 = vst [vmem:[%s231_s13 + $0x4] sm:$0xf] (%p1284_p3), %v253_v1  ;;  %v255_v2 = vld [vmem:[%s235_s12 + $0x10] sm:$0xf] (%p1284_p3) }
  0x14   : > { %256 = vst [vmem:[%s231_s13 + $0x8] sm:$0xf] (%p1284_p3), %v255_v2 }
  0x15 PF: > { %285 = sbr.rel (!%p1284_p3) target bundleno = 28 (0x1c), region = 77  ;;  %s287_s14 = sand.u32 (%p1284_p3), 1, %s1200_s22  }
  0x16   : > { %s996_s15 = smul.u32 (%p1284_p3), 24, %s1208_s24 }
  0x17   : > { %s1102_s16 = smul.u32 (%p1284_p3), 12, %s287_s14 }
  0x18   : > { %s923_s19 = scalar_lea.vmem (%p1284_p3), %s1405_s1, %s996_s15 }
  0x19   : > { %v997_v3 = vld [vmem:[%s923_s19 + $0x4] sm:$0xf] (%p1284_p3)  ;;  %v998_v4 = vld [vmem:[%s923_s19 + $0xc] sm:$0xf] (%p1284_p3)  ;;  %s289_s20 = scalar_lea.vmem (%p1284_p3), [#allocation5], %s1102_s16 }
  0x1a   : > { %311 = vst [vmem:[%s289_s20] sm:$0xf] (%p1284_p3), %v997_v3  ;;  %313 = vst [vmem:[%s289_s20 + $0x4] sm:$0xf] (%p1284_p3), %v998_v4  ;;  %v999_v5 = vld [vmem:[%s923_s19 + $0x14] sm:$0xf] (%p1284_p3) }
  0x1b   : > { %315 = vst [vmem:[%s289_s20 + $0x8] sm:$0xf] (%p1284_p3), %v999_v5 }
  0x1c PF: > { %p1000_p6 = scmp.ge.s32.totalorder %s1212_s25, 1  ;;  %p343_p7 = scmp.lt.s32.totalorder %s1212_s25, 3 }
  0x1e   : > { %p344_p8 = pnand %p1000_p6, %p343_p7 }
  0x1f   : > { %s350_s27 = sand.u32 (!%p344_p8), 1, %s1196_s21   ;;  %v1214_v6 = vmov (!%p344_p8), 0.0   ;;  %vm1215_vm0 = vmmov (!%p344_p8), 0   ;;  %vm426_vm1 = vcmask (!%p344_p8), 1041408   ;;  %vm422_vm2 = vcmask (!%p344_p8), 162816   ;;  %s1216_s7 = smov (!%p344_p8), 120  }
  0x20   : > { %347 = sbr.rel (%p344_p8) target bundleno = 438 (0x1b6), region = 118  ;;  %1060 = vmatprep.subr.bf16.mxu1 (!%p344_p8), %v1214_v6  ;;  %1064 = vmatprep.mubr.msk.bf16.mxu1 (!%p344_p8), %vm1215_vm0, %v1214_v6  ;;  %v1154_v13 = vld [vmem:[%s1407_s3] sm:$0xff] (!%p344_p8)   ;;  %v1159_v22 = vld [vmem:[%s1406_s2 + $0x8] sm:$0xff] (!%p344_p8)   ;;  %v1217_v27 = vmov (!%p344_p8), 0   ;;  %vm616_vm3 = vcmask (!%p344_p8), 982016   ;;  %vm687_vm4 = vcmask (!%p344_p8), 1048512  }
  0x21   : > { %s1103_s28 = smul.u32 (!%p344_p8), 12, %s350_s27  ;;  %1052 = vmatprep.subr.bf16.mxu0 (!%p344_p8), %v1214_v6  ;;  %1056 = vmatprep.mubr.msk.bf16.mxu0 (!%p344_p8), %vm1215_vm0, %v1214_v6  ;;  %v1165_v21 = vld [vmem:[%s1406_s2] sm:$0xff] (!%p344_p8)   ;;  %v1162_v26 = vld [vmem:[%s1407_s3 + $0x8] sm:$0xff] (!%p344_p8)   ;;  %p394_p9 = scmp.lt.s32.totalorder (!%p344_p8), %s1204_s23, 1 }
  0x22   : > { %1148 = vset.pattern.permute.xlu0 (!%p344_p8), %v1217_v27  ;;  %1149 = vset.pattern.permute.xlu1 (!%p344_p8), %v1217_v27  ;;  %v855_v49 = vld [vmem:[%s1409_s5] sm:$0xff] (!%p344_p8)  ;;  %v856_v51 = vld [vmem:[%s1409_s5 + $0x8] sm:$0xff] (!%p344_p8) }
  0x23   : > { %s352_s29 = scalar_lea.vmem (!%p344_p8), [#allocation4], %s1103_s28  ;;  %s359_s21 = scalar_lea.vmem (!%p344_p8), [#allocation5], %s1103_s28  ;;  %v840_v52 = vld [vmem:[%s1408_s4 + $0x8] sm:$0xff] (!%p344_p8)  ;;  %v839_v53 = vld [vmem:[%s1408_s4] sm:$0xff] (!%p344_p8) }
  0x24   : > { %v1150_v7 = vld [vmem:[%s352_s29] sm:$0xff] (!%p344_p8)   ;;  %v1152_v9 = vld [vmem:[%s352_s29 + $0x8] ss:$0 sps:$4 sm:$0x33] (!%p344_p8)   ;;  %v1156_v14 = vld [vmem:[%s359_s21] sm:$0xff] (!%p344_p8)  }
  0x25   : > { %v1151_v8 = vld [vmem:[%s352_s29] sm:$0xff] (!%p344_p8)   ;;  %562 = vrot.lane.b32.xlu0 (!%p344_p8), %v1150_v7, %s1216_s7  ;;  %v1153_v11 = vld [vmem:[%s352_s29 + $0x8] ss:$0 sps:$4 sm:$0x33] (!%p344_p8)   ;;  %v1160_v23 = vld [vmem:[%s359_s21] sm:$0xff] (!%p344_p8)  }
  0x26   : > { %v1155_v10 = vld [vmem:[%s352_s29] sm:$0xff] (!%p344_p8)   ;;  %1061 = vmatpush3.bf16.msra.mxu1 (!%p344_p8), %v1151_v8  ;;  %v496_v12 = vsel (!%p344_p8), %vm426_vm1, %v1153_v11, 0  ;;  %v1157_v15 = vld [vmem:[%s352_s29 + $0x8] ss:$0 sps:$4 sm:$0x33] (!%p344_p8)  }
  0x27   : > { %1062 = vmatprep.subr.bf16.mxu1 %v1214_v6  ;;  %711 = vrot.lane.b32.xlu1 %v1155_v10, %s1216_s7  ;;  %v1158_v16 = vld [vmem:[%s359_s21 + $0x8] ss:$0 sps:$4 sm:$0x33]   ;;  %v1164_v18 = vld [vmem:[%s352_s29 + $0x8] ss:$0 sps:$4 sm:$0x33]  }
  0x28   : > { %v1163_v17 = vld [vmem:[%s352_s29] sm:$0xff]   ;;  %v634_v19 = vsel %vm426_vm1, %v1158_v16, 0  ;;  %v428_v20 = vsel %vm426_vm1, %v1164_v18, 0  ;;  %s1419_s23 = smov (!%p394_p9, %s1204_s23), 1 }
  0x29   : > { %564 = vrot.lane.b32.xlu0 %v1152_v9, %s1216_s7  ;;  %1053 = vmatpush3.bf16.msra.mxu0 %v1163_v17  ;;  %v1161_v24 = vld [vmem:[%s359_s21 + $0x8] ss:$0 sps:$4 sm:$0x33]  }
  0x2a   : > { %1063 = vmatpush3.bf16.msra.mxu1 %v496_v12  ;;  %1054 = vmatprep.subr.bf16.mxu0 %v1214_v6  ;;  %v782_v25 = vsel %vm426_vm1, %v1161_v24, 0 }
  0x2b   : > { %1076 = vmatprep.subr.bf16.mxu1 %v1214_v6  ;;  %713 = vrot.lane.b32.xlu1 %v1157_v15, %s1216_s7 }
  0x2d   : > { %1065 = vmatmul.mubr.msk.bf16.vlgmr.msra.gmra.mrb[0].mxu1 %vm422_vm2, %v1154_v13  ;;  %1055 = vmatpush3.bf16.msra.mxu0 %v428_v20 }
  0x2e   : > { %1077 = vmatpush3.bf16.msra.mxu1 %v1156_v14  ;;  %1080 = vmatprep.mubr.msk.bf16.mxu1 %vm1215_vm0, %v1214_v6 }
  0x2f   : > { %1078 = vmatprep.subr.bf16.mxu1 %v1214_v6  ;;  %1068 = vmatprep.subr.bf16.mxu0 %v1214_v6 }
  0x30   : > { %1057 = vmatmul.mubr.msk.bf16.vlgmr.msra.gmra.mrb[0].mxu0 %vm422_vm2, %v1165_v21 }
  0x31   : > { %1072 = vmatprep.mubr.msk.bf16.mxu0 %vm1215_vm0, %v1214_v6 }
  0x32   : > { %1079 = vmatpush3.bf16.msra.mxu1 %v634_v19 }
  0x33   : > { %1092 = vmatprep.subr.bf16.mxu1 %v1214_v6 }
  0x35   : > { %1081 = vmatmul.mubr.msk.bf16.vlgmr.msra.gmra.mrb[4].mxu1 %vm422_vm2, %v1159_v22 }
  0x36   : > { %1093 = vmatpush3.bf16.msra.mxu1 %v1160_v23  ;;  %1096 = vmatprep.mubr.msk.bf16.mxu1 %vm1215_vm0, %v1214_v6 }
  0x37   : > { %1094 = vmatprep.subr.bf16.mxu1 %v1214_v6 }
  0x3a   : > { %1095 = vmatpush3.bf16.msra.mxu1 %v782_v25 }
  0x3d   : > { %1097 = vmatmul.mubr.msk.bf16.vlgmr.msra.gmra.mrb[8].mxu1 %vm422_vm2, %v1162_v26 }
  0x97   : > { %v563_v28 = vpop.permute.xlu0 %562 }
  0x98   : > { %1069 = vmatpush3.bf16.msra.mxu0 %v563_v28 }
  0x99   : > { %1070 = vmatprep.subr.bf16.mxu0 %v1214_v6  ;;  %v712_v29 = vpop.permute.xlu1 %711 }
  0x9b   : > { %v565_v30 = vpop.permute.xlu0 %564 }
  0x9c   : > { %v571_v31 = vsel %vm426_vm1, %v565_v30, 0 }
  0x9d   : > { %1071 = vmatpush3.bf16.msra.mxu0 %v571_v31  ;;  %v714_v32 = vpop.permute.xlu1 %713 }
  0x9e   : > { %1084 = vmatprep.subr.bf16.mxu0 %v1214_v6  ;;  %v720_v33 = vsel %vm426_vm1, %v714_v32, 0 }
  0xa0   : > { %1073 = vmatmul.mubr.msk.bf16.vlgmr.msra.gmra.mrb[4].mxu0 %vm422_vm2, %v1159_v22 }
  0xa1   : > { %1085 = vmatpush3.bf16.msra.mxu0 %v712_v29  ;;  %1088 = vmatprep.mubr.msk.bf16.mxu0 %vm1215_vm0, %v1214_v6 }
  0xa2   : > { %1086 = vmatprep.subr.bf16.mxu0 %v1214_v6 }
  0xa5   : > { %1087 = vmatpush3.bf16.msra.mxu0 %v720_v33 }
  0xa8   : > { %1089 = vmatmul.mubr.msk.bf16.vlgmr.msra.gmra.mrb[8].mxu0 %vm422_vm2, %v1162_v26 }
 0x100   : > { %v532_v34 = vpop.f32.mrb[0].mxu1 }
 0x101   : > { %539 = vst [vmem:[#allocation3] sm:$0xff] %v532_v34  ;;  %v1066_v35 = vpop.f32.mrb[1].mxu1 }
 0x102   : > { %v535_v36 = vpop.f32.mrb[2].mxu1 }
 0x103   : > { %540 = vst [vmem:[#allocation3 + $0x8] sm:$0xff] %v535_v36  ;;  %v1067_v37 = vpop.f32.mrb[3].mxu1  ;;  %v464_v38 = vpop.f32.mrb[0].mxu0 }
 0x104   : > { %471 = vst [vmem:[#allocation2] sm:$0xff] %v464_v38  ;;  %v1058_v39 = vpop.f32.mrb[1].mxu0 }
 0x105   : > { %v467_v41 = vpop.f32.mrb[2].mxu0 }
 0x106   : > { %472 = vst [vmem:[#allocation2 + $0x8] sm:$0xff] %v467_v41  ;;  %v1059_v43 = vpop.f32.mrb[3].mxu0 }
 0x108   : > { %v670_v40 = vpop.f32.mrb[4].mxu1 }
 0x109   : > { %v1082_v42 = vpop.f32.mrb[5].mxu1 }
 0x10a   : > { %v673_v44 = vpop.f32.mrb[6].mxu1 }
 0x10b   : > { %v1083_v45 = vpop.f32.mrb[7].mxu1 }
 0x110   : > { %v818_v46 = vpop.f32.mrb[8].mxu1 }
 0x111   : > { %827 = vrot.lane.b32.xlu0 %v818_v46, %s1216_s7  ;;  %v1098_v47 = vpop.f32.mrb[9].mxu1 }
 0x112   : > { %v821_v48 = vpop.f32.mrb[10].mxu1 }
 0x113   : > { %829 = vrot.lane.b32.xlu1 %v821_v48, %s1216_s7  ;;  %v1099_v50 = vpop.f32.mrb[11].mxu1 }
 0x115   : > { %859 = vperm.xlu0 %1148, %v855_v49  }
 0x117   : > { %864 = vperm.xlu1 %1149, %v856_v51  }
 0x119   : > { %681 = vrot.lane.b32.xlu0 %v673_v44, %s1216_s7 }
 0x11b   : > { %679 = vrot.lane.b32.xlu1 %v670_v40, %s1216_s7  ;;  %s1033_s7 = sshll.u32 %s1419_s23, 4 }
 0x11c   : > { %s401_s9 = scalar_lea.vmem %s1410_s6, %s1033_s7 }
 0x11d   : > { %848 = vperm.xlu0 %1148, %v840_v52  }
 0x11f   : > { %843 = vperm.xlu1 %1149, %v839_v53  }
 0x173   : > { %v607_v54 = vpop.f32.mrb[4].mxu0 }
 0x174   : > { %v614_v55 = vadd.f32 %v607_v54, %v464_v38  ;;  %v1074_v56 = vpop.f32.mrb[5].mxu0 }
 0x175   : > { %v610_v57 = vpop.f32.mrb[6].mxu0 }
 0x176   : > { %617 = vst.msk [vmem:[#allocation2] sm:$0xff] %vm616_vm3, %v614_v55  ;;  %v615_v58 = vadd.f32 %v610_v57, %v467_v41  ;;  %v1075_v59 = vpop.f32.mrb[7].mxu0 }
 0x178   : > { %618 = vst.msk [vmem:[#allocation2 + $0x8] sm:$0xff] %vm616_vm3, %v615_v58 }
 0x17b   : > { %v756_v60 = vpop.f32.mrb[8].mxu0 }
 0x17c   : > { %v763_v61 = vadd.f32 %v756_v60, %v532_v34  ;;  %v1090_v62 = vpop.f32.mrb[9].mxu0 }
 0x17d   : > { %v759_v63 = vpop.f32.mrb[10].mxu0  ;;  %v619_v20 = vld [vmem:[#allocation2] sm:$0xff] }
 0x17e   : > { %765 = vst.msk [vmem:[#allocation3] sm:$0xff] %vm616_vm3, %v763_v61  ;;  %v764_v0 = vadd.f32 %v759_v63, %v535_v36  ;;  %v1091_v1 = vpop.f32.mrb[11].mxu0 }
 0x17f   : > { %v620_v16 = vld [vmem:[#allocation2 + $0x8] sm:$0xff] }
 0x180   : > { %766 = vst.msk [vmem:[#allocation3 + $0x8] sm:$0xff] %vm616_vm3, %v764_v0 }
 0x183   : > { %v828_v2 = vpop.permute.xlu0 %827 }
 0x185   : > { %v767_v3 = vld [vmem:[#allocation3] sm:$0xff]  ;;  %v830_v5 = vpop.permute.xlu1 %829 }
 0x186   : > { %v833_v4 = vadd.f32 %v828_v2, %v767_v3 }
 0x187   : > { %v768_v6 = vld [vmem:[#allocation3 + $0x8] sm:$0xff] }
 0x188   : > { %835 = vst.msk [vmem:[#allocation3] sm:$0xff] %vm687_vm4, %v833_v4  ;;  %v834_v7 = vadd.f32 %v830_v5, %v768_v6 }
 0x18a   : > { %836 = vst.msk [vmem:[#allocation3 + $0x8] sm:$0xff] %vm687_vm4, %v834_v7 }
 0x18f   : > { %v853_v9 = vld [vmem:[#allocation3] sm:$0xff] }
 0x191   : > { %v854_v12 = vld [vmem:[#allocation3 + $0x8] sm:$0xff] }
 0x194   : > { %v860_v8 = vpop.permute.xlu0 %859 }
 0x195   : > { %v867_v10 = vadd.f32 %v860_v8, %v853_v9 }
 0x196   : > { %v865_v11 = vpop.permute.xlu1 %864 }
 0x197   : > { %v1029_v13 = vmul.f32 -1.442695, %v867_v10  ;;  %v868_v14 = vadd.f32 %v865_v11, %v854_v12 }
 0x198   : > { %v682_v15 = vpop.permute.xlu0 %681 }
 0x199   : > { %1166 = vpow2.f32 %v1029_v13  ;;  %v1030_v17 = vmul.f32 -1.442695, %v868_v14  ;;  %v686_v18 = vadd.f32 %v682_v15, %v620_v16 }
 0x19a   : > { %v680_v19 = vpop.permute.xlu1 %679 }
 0x19b   : > { %1168 = vpow2.f32 %v1030_v17  ;;  %689 = vst.msk [vmem:[#allocation2 + $0x8] sm:$0xff] %vm687_vm4, %v686_v18  ;;  %v685_v21 = vadd.f32 %v680_v19, %v619_v20 }
 0x19c   : > { %v849_v31 = vpop.permute.xlu0 %848 }
 0x19d   : > { %688 = vst.msk [vmem:[#allocation2] sm:$0xff] %vm687_vm4, %v685_v21 }
 0x19e   : > { %v844_v28 = vpop.permute.xlu1 %843 }
 0x1a2   : > { %v838_v27 = vld [vmem:[#allocation2 + $0x8] sm:$0xff] }
 0x1a3   : > { %v1167_v22 = vpop.eup %1166  ;;  %v852_v32 = vadd.f32 %v849_v31, %v838_v27 }
 0x1a4   : > { %v875_v23 = vadd.f32 1.0, %v1167_v22  ;;  %v837_v26 = vld [vmem:[#allocation2] sm:$0xff] }
 0x1a5   : > { %v1169_v24 = vpop.eup %1168  ;;  %v851_v29 = vadd.f32 %v844_v28, %v837_v26 }
 0x1a6   : > { %1170 = vrcp.f32 %v875_v23  ;;  %v876_v25 = vadd.f32 1.0, %v1169_v24 }
 0x1a8   : > { %1172 = vrcp.f32 %v876_v25 }
 0x1b0   : > { %v1171_v30 = vpop.eup %1170 }
 0x1b1   : > { %v881_v33 = vmul.f32 %v1171_v30, %v851_v29 }
 0x1b2   : > { %v1173_v34 = vpop.eup %1172 }
 0x1b3   : > { %v882_v35 = vmul.f32 %v1173_v34, %v852_v32  ;;  %883 = vst [vmem:[%s401_s9] sm:$0xff] %v881_v33 }
 0x1b5   : > { %884 = vst [vmem:[%s401_s9 + $0x8] sm:$0xff] %v882_v35 }
 0x1b6 PF: > { %s16_s25 = sadd.s32 1, %s1212_s25   ;;  %s1412_s21 = smov %s1200_s22 }
 0x1b7   : > { %p13_p10 = scmp.ge.s32.totalorder %s16_s25, 4   ;;  %s1413_s22 = smov %s1292_s30 }
 0x1b8   : > { %s1414_s23 = smov %s1208_s24  ;;  %s1415_s24 = smov %s1417_s26 }
 0x1b9   :  { %15 = sbr.rel (!%p13_p10) target bundleno = 3 (0x3), region = 171 }

</bundles_post_ra>
